<compile_context>
chip_gen: v6e
topology: v6e:2x2x1
jax: 0.10.0
libtpu: 0.0.40
codegen_flags: <defaults>
</compile_context>

<pallas_src>
import functools
import math

import jax
import jax.numpy as jnp
from jax import lax
from jax.experimental import pallas as pl
from jax.experimental.pallas import tpu as pltpu


# TODO(synk): flip to True (tanh GELU -> EUP slot, faster on the VALU-bound depthwise
# path) when bit-exact torch.nn.GELU() matching is not required.
_APPROX_GELU = False


def _gelu(x):
    if _APPROX_GELU:
        return jax.nn.gelu(x, approximate=True)
    # exact (erf-based) GELU, matching torch.nn.GELU() default
    return 0.5 * x * (1.0 + lax.erf(x * (1.0 / math.sqrt(2.0))))


def _pick_tile(full, candidates):
    """Largest candidate that evenly divides `full`, else the full extent (no tiling)."""
    for c in candidates:
        if full >= c and full % c == 0:
            return c
    return full


# ---------------------------------------------------------------------------
# Kernel 1: tiled (bf16 matmul + bias + GELU + BN affine) with f32 accumulator.
# Used for the patch-embedding conv expressed as a patch matmul.
# ---------------------------------------------------------------------------
def _matmul_gelu_bn_kernel(x_ref, w_ref, b_ref, scale_ref, shift_ref, o_ref, acc_ref):
    k = pl.program_id(2)

    @pl.when(k == 0)
    def _():
        acc_ref[...] = jnp.zeros_like(acc_ref)

    acc_ref[...] += jnp.dot(x_ref[...], w_ref[...], preferred_element_type=jnp.float32)

    @pl.when(k == pl.num_programs(2) - 1)
    def _():
        y = acc_ref[...] + b_ref[...]
        y = _gelu(y)
        o_ref[...] = y * scale_ref[...] + shift_ref[...]


def matmul_gelu_bn(x2d, w, b, scale, shift):
    M, K = x2d.shape
    _, Nout = w.shape
    TM = _pick_tile(M, (512, 256, 128, 64, 32, 16, 8))
    TK = _pick_tile(K, (512, 256, 128))
    TN = _pick_tile(Nout, (512, 256, 128))
    grid = (M // TM, Nout // TN, K // TK)

    xb = x2d.astype(jnp.bfloat16)   # MXU-native operands, f32 accumulation below
    wb = w.astype(jnp.bfloat16)

    return pl.pallas_call(
        _matmul_gelu_bn_kernel,
        out_shape=jax.ShapeDtypeStruct((M, Nout), jnp.float32),
        grid_spec=pltpu.PrefetchScalarGridSpec(
            num_scalar_prefetch=0,
            grid=grid,
            in_specs=[
                pl.BlockSpec((TM, TK), lambda i, j, k: (i, k)),
                pl.BlockSpec((TK, TN), lambda i, j, k: (k, j)),
                pl.BlockSpec((1, TN), lambda i, j, k: (0, j)),
                pl.BlockSpec((1, TN), lambda i, j, k: (0, j)),
                pl.BlockSpec((1, TN), lambda i, j, k: (0, j)),
            ],
            out_specs=pl.BlockSpec((TM, TN), lambda i, j, k: (i, j)),
            scratch_shapes=[pltpu.VMEM((TM, TN), jnp.float32)],
        ),
        compiler_params=pltpu.CompilerParams(
            dimension_semantics=("parallel", "parallel", "arbitrary")),
    )(xb, wb, b.reshape(1, -1), scale.reshape(1, -1), shift.reshape(1, -1))


# ---------------------------------------------------------------------------
# Kernel 2: one fused ConvMixer block per grid step:
#   Residual( depthwise KxK conv + bias + GELU + BN )  ->  1x1 conv + bias + GELU + BN
# The depthwise result stays in VMEM and feeds the MXU pointwise matmul directly.
# Grid over batch; each step processes one full (H, W, C) image.
# ---------------------------------------------------------------------------
def _block_kernel(H, W, K, pad,
                  xpad_ref, dww_ref, dwb_ref, dws_ref, dwsh_ref,
                  pww_ref, pwb_ref, pws_ref, pwsh_ref, o_ref):
    w_all = dww_ref[...]                                  # (K*K, C) -- load taps once
    C = w_all.shape[-1]
    acc = jnp.zeros((1, H, W, C), jnp.float32)
    x_center = None
    for dx in range(K):
        # One (possibly unaligned) sublane shift along W per dx, reused for all dy;
        # the dy slice is along a major dim (cheap addressing, no relayout).
        x_dx = xpad_ref[:, :, dx:dx + W, :]               # (1, H+2*pad, W, C)
        for dy in range(K):
            acc = acc + x_dx[:, dy:dy + H, :, :] * w_all[dy * K + dx, :]
        if dx == pad:
            x_center = x_dx[:, pad:pad + H, :, :]         # residual source (center slice)

    # depthwise epilogue (f32 on the VPU)
    y = acc + dwb_ref[...]
    y = _gelu(y)
    y = y * dws_ref[...] + dwsh_ref[...]
    y = y + x_center                                      # residual add

    # fused 1x1 pointwise conv on the MXU (bf16 operands, f32 accumulation)
    y2 = y.reshape(H * W, C).astype(jnp.bfloat16)
    z = jnp.dot(y2, pww_ref[...], preferred_element_type=jnp.float32)
    z = z + pwb_ref[...]
    z = _gelu(z)
    z = z * pws_ref[...] + pwsh_ref[...]
    o_ref[...] = z.reshape(1, H, W, C)


def convmixer_block(x_nhwc, blk, K):
    N, H, W, C = x_nhwc.shape
    pad = (K - 1) // 2
    # TODO(synk): for even K, PyTorch padding='same' pads asymmetrically; only odd K matches.
    xpad = jnp.pad(x_nhwc, ((0, 0), (pad, pad), (pad, pad), (0, 0)))
    Hp_, Wp_ = H + 2 * pad, W + 2 * pad
    # TODO(synk): for very large dim/H, add an H-row tile grid axis (halo-aware) so the
    # per-step working set fits v7x's 64 MiB VMEM.
    kern = functools.partial(_block_kernel, H, W, K, pad)
    pw_w_bf16 = blk["pw_w"].astype(jnp.bfloat16)
    return pl.pallas_call(
        kern,
        out_shape=jax.ShapeDtypeStruct((N, H, W, C), jnp.float32),
        grid=(N,),
        in_specs=[
            pl.BlockSpec((1, Hp_, Wp_, C), lambda n: (n, 0, 0, 0)),
            pl.BlockSpec((K * K, C), lambda n: (0, 0)),
            pl.BlockSpec((1, C), lambda n: (0, 0)),
            pl.BlockSpec((1, C), lambda n: (0, 0)),
            pl.BlockSpec((1, C), lambda n: (0, 0)),
            pl.BlockSpec((C, C), lambda n: (0, 0)),
            pl.BlockSpec((1, C), lambda n: (0, 0)),
            pl.BlockSpec((1, C), lambda n: (0, 0)),
            pl.BlockSpec((1, C), lambda n: (0, 0)),
        ],
        out_specs=pl.BlockSpec((1, H, W, C), lambda n: (n, 0, 0, 0)),
        compiler_params=pltpu.CompilerParams(dimension_semantics=("parallel",)),
    )(xpad,
      blk["dw_w"], blk["dw_b"].reshape(1, -1),
      blk["dw_bn_scale"].reshape(1, -1), blk["dw_bn_shift"].reshape(1, -1),
      pw_w_bf16, blk["pw_b"].reshape(1, -1),
      blk["pw_bn_scale"].reshape(1, -1), blk["pw_bn_shift"].reshape(1, -1))


# ---------------------------------------------------------------------------
# Kernel 3: fused head: global average pool (over H*W) + linear classifier.
# Tiled over batch; classifier output padded to 128 lanes (sliced in the wrapper).
# ---------------------------------------------------------------------------
def _head_kernel(x_ref, w_ref, b_ref, o_ref):
    pooled = jnp.mean(x_ref[...], axis=1)                 # (1, C) in f32
    z = jnp.dot(pooled.astype(jnp.bfloat16), w_ref[...],
                preferred_element_type=jnp.float32) + b_ref[...]
    o_ref[...] = z.reshape(o_ref.shape)


def head(x_nhwc, w_head, b_head, n_classes):
    N, H, W, C = x_nhwc.shape
    CP = max(128, ((n_classes + 127) // 128) * 128)       # lane-dense output width
    wpad = jnp.zeros((C, CP), jnp.float32).at[:, :n_classes].set(w_head).astype(jnp.bfloat16)
    bpad = jnp.zeros((1, CP), jnp.float32).at[:, :n_classes].set(b_head.reshape(1, -1))
    out = pl.pallas_call(
        _head_kernel,
        out_shape=jax.ShapeDtypeStruct((N, 1, CP), jnp.float32),
        grid=(N,),
        in_specs=[
            pl.BlockSpec((1, H * W, C), lambda n: (n, 0, 0)),
            pl.BlockSpec((C, CP), lambda n: (0, 0)),
            pl.BlockSpec((1, CP), lambda n: (0, 0)),
        ],
        out_specs=pl.BlockSpec((1, 1, CP), lambda n: (n, 0, 0)),
        compiler_params=pltpu.CompilerParams(dimension_semantics=("parallel",)),
    )(x_nhwc.reshape(N, H * W, C), wpad, bpad)
    return out.reshape(N, CP)[:, :n_classes]


# ---------------------------------------------------------------------------
# Full forward
# ---------------------------------------------------------------------------
def convmixer_forward(x_nchw, params, *, dim, depth, kernel_size, patch_size, n_classes):
    N, Cin, H, W = x_nchw.shape
    p = patch_size
    Hp, Wp = H // p, W // p
    x = jnp.transpose(x_nchw, (0, 2, 3, 1))                      # NCHW -> NHWC

    # patch embedding = strided conv == patch-extract + tiled matmul
    patches = (
        x.reshape(N, Hp, p, Wp, p, Cin)
        .transpose(0, 1, 3, 2, 4, 5)
        .reshape(N * Hp * Wp, p * p * Cin)
    )
    y = matmul_gelu_bn(patches, params["stem_w"], params["stem_b"],
                       params["stem_bn_scale"], params["stem_bn_shift"])
    y = y.reshape(N, Hp, Wp, dim)

    for i in range(depth):
        # fused: Residual(dw conv -> GELU -> BN) -> 1x1 conv -> GELU -> BN
        y = convmixer_block(y, params["blocks"][i], kernel_size)

    # adaptive avg pool (1,1) + flatten + linear
    return head(y, params["head_w"], params["head_b"], n_classes)


# ---------------------------------------------------------------------------
# Deterministic parameter initialization (synthetic weights)
# ---------------------------------------------------------------------------
def _bn_fold(gamma, beta, mean, var, eps=1e-5):
    scale = gamma / jnp.sqrt(var + eps)
    shift = beta - mean * scale
    return scale, shift


def init_params(key, dim, depth, kernel_size, patch_size, n_classes, cin=3):
    def nrm(k, shape, s=0.1):
        return s * jax.random.normal(k, shape, jnp.float32)

    keys = iter(jax.random.split(key, 6 + depth * 12 + 2))
    p, K = patch_size, kernel_size
    params = {}

    def bn_params():
        g = 1.0 + nrm(next(keys), (dim,), 0.1)
        b = nrm(next(keys), (dim,), 0.1)
        m = nrm(next(keys), (dim,), 0.1)
        v = 1.0 + jnp.abs(nrm(next(keys), (dim,), 0.1))
        return _bn_fold(g, b, m, v)

    params["stem_w"] = nrm(next(keys), (p * p * cin, dim))   # (kh,kw,cin) flat -> dim
    params["stem_b"] = nrm(next(keys), (dim,), 0.05)
    params["stem_bn_scale"], params["stem_bn_shift"] = bn_params()

    blocks = []
    for _ in range(depth):
        blk = {}
        blk["dw_w"] = nrm(next(keys), (K * K, dim))          # depthwise taps per channel
        blk["dw_b"] = nrm(next(keys), (dim,), 0.05)
        blk["dw_bn_scale"], blk["dw_bn_shift"] = bn_params()
        blk["pw_w"] = nrm(next(keys), (dim, dim))
        blk["pw_b"] = nrm(next(keys), (dim,), 0.05)
        blk["pw_bn_scale"], blk["pw_bn_shift"] = bn_params()
        blocks.append(blk)
    params["blocks"] = blocks

    params["head_w"] = nrm(next(keys), (dim, n_classes))
    params["head_b"] = nrm(next(keys), (n_classes,), 0.05)
    return params


# ---------------------------------------------------------------------------
# Pure-JAX reference (lax.conv / einsum) for correctness checking.
# Mirrors the kernels' bf16 matmul operands (f32 accumulation) so the comparison
# is tight; elementwise epilogues stay in f32 in both paths.
# ---------------------------------------------------------------------------
def ref_forward(x_nchw, params, *, dim, depth, kernel_size, patch_size, n_classes):
    x = jnp.transpose(x_nchw, (0, 2, 3, 1))
    p, K = patch_size, kernel_size
    cin = x.shape[-1]
    dn = ("NHWC", "HWIO", "NHWC")

    stem_w = params["stem_w"].reshape(p, p, cin, dim)
    y = lax.conv_general_dilated(x.astype(jnp.bfloat16), stem_w.astype(jnp.bfloat16),
                                 (p, p), "VALID", dimension_numbers=dn,
                                 preferred_element_type=jnp.float32)
    y = _gelu(y + params["stem_b"])
    y = y * params["stem_bn_scale"] + params["stem_bn_shift"]

    for i in range(depth):
        blk = params["blocks"][i]
        dw_w = blk["dw_w"].reshape(K, K, 1, dim)
        z = lax.conv_general_dilated(y, dw_w, (1, 1), "SAME",
                                     dimension_numbers=dn, feature_group_count=dim)
        z = _gelu(z + blk["dw_b"])
        z = z * blk["dw_bn_scale"] + blk["dw_bn_shift"]
        y = z + y
        z = jnp.einsum("nhwc,cd->nhwd",
                       y.astype(jnp.bfloat16), blk["pw_w"].astype(jnp.bfloat16),
                       preferred_element_type=jnp.float32) + blk["pw_b"]
        z = _gelu(z)
        y = z * blk["pw_bn_scale"] + blk["pw_bn_shift"]

    pooled = jnp.mean(y, axis=(1, 2))
    return jnp.dot(pooled.astype(jnp.bfloat16), params["head_w"].astype(jnp.bfloat16),
                   preferred_element_type=jnp.float32) + params["head_b"]


if __name__ == "__main__":
    dim, depth, kernel_size, patch_size, n_classes = 32, 2, 5, 2, 10
    key = jax.random.PRNGKey(0)
    kx, kp = jax.random.split(key)

    x = jax.random.normal(kx, (2, 3, 16, 16), jnp.float32)   # NCHW like PyTorch
    params = init_params(kp, dim, depth, kernel_size, patch_size, n_classes)

    out = convmixer_forward(x, params, dim=dim, depth=depth, kernel_size=kernel_size,
                            patch_size=patch_size, n_classes=n_classes)
    out = jax.block_until_ready(out)

    ref = ref_forward(x, params, dim=dim, depth=depth, kernel_size=kernel_size,
                      patch_size=patch_size, n_classes=n_classes)
    assert out.shape == (2, n_classes)
    assert jnp.allclose(out, ref, atol=1e-2, rtol=1e-2), "mismatch vs reference"
    print("KERNEL_OK")
</pallas_src>

<mosaic_0001>
module attributes {stable_mosaic.version = 11 : i64} {
  func.func @_matmul_gelu_bn_kernel(%arg0: i32, %arg1: i32, %arg2: i32, %arg3: memref<128x12xbf16, #tpu.memory_space<vmem>>, %arg4: memref<12x32xbf16, #tpu.memory_space<vmem>>, %arg5: memref<1x32xf32, #tpu.memory_space<vmem>>, %arg6: memref<1x32xf32, #tpu.memory_space<vmem>>, %arg7: memref<1x32xf32, #tpu.memory_space<vmem>>, %arg8: memref<128x32xf32, #tpu.memory_space<vmem>>, %arg9: memref<128x32xf32, #tpu.memory_space<vmem>>) attributes {dimension_semantics = [#tpu.dimension_semantics<parallel>, #tpu.dimension_semantics<parallel>, #tpu.dimension_semantics<arbitrary>], iteration_bounds = array<i64: 1, 1, 1>, scalar_prefetch = 0 : i64, scratch_operands = 1 : i64, tpu.core_type = #tpu.core_type<tc>, window_params = [{transform_indices = @transform_0, window_bounds = array<i64: 128, 12>}, {transform_indices = @transform_1, window_bounds = array<i64: 12, 32>}, {transform_indices = @transform_2, window_bounds = array<i64: 1, 32>}, {transform_indices = @transform_3, window_bounds = array<i64: 1, 32>}, {transform_indices = @transform_4, window_bounds = array<i64: 1, 32>}, {transform_indices = @transform_5, window_bounds = array<i64: 128, 32>}]} {
    %c0_i32 = arith.constant 0 : i32
    %0 = arith.cmpi eq, %arg2, %c0_i32 : i32
    %1 = arith.extui %0 : i1 to i32
    %c0_i32_0 = arith.constant 0 : i32
    %2 = arith.cmpi ne, %1, %c0_i32_0 : i32
    scf.if %2 {
      %cst_10 = arith.constant 0.000000e+00 : f32
      %12 = vector.broadcast %cst_10 : f32 to vector<128x32xf32>
      %c0_11 = arith.constant 0 : index
      %c0_12 = arith.constant 0 : index
      %13 = vector.load %arg9[%c0_11, %c0_12] : memref<128x32xf32, #tpu.memory_space<vmem>>, vector<128x32xf32>
      tpu.vector_store %arg9[%c0_11, %c0_12], %12 {strides = array<i32>} : memref<128x32xf32, #tpu.memory_space<vmem>>, vector<128x32xf32>,
    } else {
    }
    %c0 = arith.constant 0 : index
    %c0_1 = arith.constant 0 : index
    %3 = vector.load %arg9[%c0, %c0_1] : memref<128x32xf32, #tpu.memory_space<vmem>>, vector<128x32xf32>
    %c0_2 = arith.constant 0 : index
    %c0_3 = arith.constant 0 : index
    %4 = vector.load %arg3[%c0_2, %c0_3] : memref<128x12xbf16, #tpu.memory_space<vmem>>, vector<128x12xbf16>
    %c0_4 = arith.constant 0 : index
    %c0_5 = arith.constant 0 : index
    %5 = vector.load %arg4[%c0_4, %c0_5] : memref<12x32xbf16, #tpu.memory_space<vmem>>, vector<12x32xbf16>
    %cst = arith.constant dense<0.000000e+00> : vector<128x32xf32>
    %6 = tpu.matmul %4, %5, %cst {dimension_numbers = #tpu.dot_dimension_numbers<[1], [0], [0], [1], [0, 0, 1, 1], [], []>} : vector<128x12xbf16>, vector<12x32xbf16>, vector<128x32xf32> -> vector<128x32xf32>
    %7 = arith.addf %3, %6 : vector<128x32xf32>
    %c0_6 = arith.constant 0 : index
    %c0_7 = arith.constant 0 : index
    %8 = vector.load %arg9[%c0_6, %c0_7] : memref<128x32xf32, #tpu.memory_space<vmem>>, vector<128x32xf32>
    tpu.vector_store %arg9[%c0_6, %c0_7], %7 {strides = array<i32>} : memref<128x32xf32, #tpu.memory_space<vmem>>, vector<128x32xf32>,
    %c0_i32_8 = arith.constant 0 : i32
    %9 = arith.cmpi eq, %arg2, %c0_i32_8 : i32
    %10 = arith.extui %9 : i1 to i32
    %c0_i32_9 = arith.constant 0 : i32
    %11 = arith.cmpi ne, %10, %c0_i32_9 : i32
    scf.if %11 {
      %c0_10 = arith.constant 0 : index
      %c0_11 = arith.constant 0 : index
      %12 = vector.load %arg9[%c0_10, %c0_11] : memref<128x32xf32, #tpu.memory_space<vmem>>, vector<128x32xf32>
      %c0_12 = arith.constant 0 : index
      %c0_13 = arith.constant 0 : index
      %13 = vector.load %arg5[%c0_12, %c0_13] : memref<1x32xf32, #tpu.memory_space<vmem>>, vector<1x32xf32>
      %14 = vector.broadcast %13 : vector<1x32xf32> to vector<128x32xf32>
      %15 = arith.addf %12, %14 : vector<128x32xf32>
      %cst_14 = arith.constant 5.000000e-01 : f32
      %16 = vector.broadcast %cst_14 : f32 to vector<128x32xf32>
      %17 = arith.mulf %16, %15 : vector<128x32xf32>
      %cst_15 = arith.constant 0.707106769 : f32
      %18 = vector.broadcast %cst_15 : f32 to vector<128x32xf32>
      %19 = arith.mulf %15, %18 : vector<128x32xf32>
      %20 = math.erf %19 : vector<128x32xf32>
      %cst_16 = arith.constant 1.000000e+00 : f32
      %21 = vector.broadcast %cst_16 : f32 to vector<128x32xf32>
      %22 = arith.addf %21, %20 : vector<128x32xf32>
      %23 = arith.mulf %17, %22 : vector<128x32xf32>
      %c0_17 = arith.constant 0 : index
      %c0_18 = arith.constant 0 : index
      %24 = vector.load %arg6[%c0_17, %c0_18] : memref<1x32xf32, #tpu.memory_space<vmem>>, vector<1x32xf32>
      %25 = vector.broadcast %24 : vector<1x32xf32> to vector<128x32xf32>
      %26 = arith.mulf %23, %25 : vector<128x32xf32>
      %c0_19 = arith.constant 0 : index
      %c0_20 = arith.constant 0 : index
      %27 = vector.load %arg7[%c0_19, %c0_20] : memref<1x32xf32, #tpu.memory_space<vmem>>, vector<1x32xf32>
      %28 = vector.broadcast %27 : vector<1x32xf32> to vector<128x32xf32>
      %29 = arith.addf %26, %28 : vector<128x32xf32>
      %c0_21 = arith.constant 0 : index
      %c0_22 = arith.constant 0 : index
      %30 = vector.load %arg8[%c0_21, %c0_22] : memref<128x32xf32, #tpu.memory_space<vmem>>, vector<128x32xf32>
      tpu.vector_store %arg8[%c0_21, %c0_22], %29 {strides = array<i32>} : memref<128x32xf32, #tpu.memory_space<vmem>>, vector<128x32xf32>,
    } else {
    }
    return
  }
  func.func @transform_0(%arg0: i32, %arg1: i32, %arg2: i32) -> (i32, i32) {
    %c0_i32 = arith.constant 0 : i32
    return %arg0, %arg2 : i32, i32
  }
  func.func @transform_1(%arg0: i32, %arg1: i32, %arg2: i32) -> (i32, i32) {
    %c0_i32 = arith.constant 0 : i32
    return %arg2, %arg1 : i32, i32
  }
  func.func @transform_2(%arg0: i32, %arg1: i32, %arg2: i32) -> (i32, i32) {
    %c0_i32 = arith.constant 0 : i32
    %c0_i32_0 = arith.constant 0 : i32
    return %c0_i32, %arg1 : i32, i32
  }
  func.func @transform_3(%arg0: i32, %arg1: i32, %arg2: i32) -> (i32, i32) {
    %c0_i32 = arith.constant 0 : i32
    %c0_i32_0 = arith.constant 0 : i32
    return %c0_i32, %arg1 : i32, i32
  }
  func.func @transform_4(%arg0: i32, %arg1: i32, %arg2: i32) -> (i32, i32) {
    %c0_i32 = arith.constant 0 : i32
    %c0_i32_0 = arith.constant 0 : i32
    return %c0_i32, %arg1 : i32, i32
  }
  func.func @transform_5(%arg0: i32, %arg1: i32, %arg2: i32) -> (i32, i32) {
    %c0_i32 = arith.constant 0 : i32
    return %arg0, %arg1 : i32, i32
  }
}

</mosaic_0001>

<bundles_post_ra>
// kernel: tpu_custom_call.1
= control target key start
LH: loop header
LB: loop body
LE: loop exit
PB: predicated region body
PF: predicated region fallthrough
CT: control target
= control target key end

     0   :  { %vm146_vm0 = vcmask 1045504   ;;  %vm25_vm1 = vcmask 261120   ;;  %v561_v1 = vmov 0.0   ;;  %vm121_vm2 = vcmask 97280   ;;  %s805_s1 = inlined_call_operand.vmem [shape: bf16[12,32], index: 1, kind: input, shape index: {}]   ;;  %s806_s0 = inlined_call_operand.vmem [shape: bf16[128,12], index: 0, kind: input, shape index: {}]   ;;  %s807_s2 = inlined_call_operand.vmem [shape: f32[1,32], index: 2, kind: input, shape index: {}]   ;;  %s808_s3 = inlined_call_operand.vmem [shape: f32[1,32], index: 3, kind: input, shape index: {}]   ;;  %s809_s4 = inlined_call_operand.vmem [shape: f32[1,32], index: 4, kind: input, shape index: {}]   ;;  %s810_s5 = inlined_call_operand.vmem [shape: f32[128,32], index: 5, kind: output, shape index: {}]  }
   0x1   :  { %v520_v0 = vld [vmem:[%s805_s1] sm:$0x3f]   ;;  %28 = vst.msk [vmem:[#allocation2 + $0x10] sm:$0xff] %vm25_vm1, %v561_v1  ;;  %26 = vst.msk [vmem:[#allocation2] sm:$0xff] %vm25_vm1, %v561_v1  ;;  %v523_v5 = vld [vmem:[%s806_s0 + $0x8] sm:$0xff]  }
   0x2   :  { %27 = vst.msk [vmem:[#allocation2 + $0x8] sm:$0xff] %vm25_vm1, %v561_v1  ;;  %29 = vst.msk [vmem:[#allocation2 + $0x18] sm:$0xff] %vm25_vm1, %v561_v1  ;;  %v521_v2 = vld [vmem:[%s806_s0] sm:$0xff]   ;;  %517 = vmatprep.subr.msk.bf16.mxu0 %vm146_vm0, %v520_v0  ;;  %518 = vmatprep.subr.msk.bf16.mxu1 %vm146_vm0, %v520_v0  ;;  %v148_v3 = vsel %vm146_vm0, %v520_v0, 0  ;;  %v524_v6 = vld [vmem:[%s806_s0 + $0x28] sm:$0xff]  }
   0x3   :  { %30 = vst.msk [vmem:[#allocation2 + $0x20] sm:$0xff] %vm25_vm1, %v561_v1  ;;  %31 = vst.msk [vmem:[#allocation2 + $0x28] sm:$0xff] %vm25_vm1, %v561_v1  ;;  %v522_v4 = vld [vmem:[%s806_s0 + $0x20] sm:$0xff]   ;;  %498 = vmatpush3.bf16.msra.mxu0 %v148_v3  ;;  %516 = vmatpush3.bf16.msra.mxu1 %v148_v3  ;;  %v525_v7 = vld [vmem:[%s806_s0 + $0x10] sm:$0xff]  }
   0x4   :  { %32 = vst.msk [vmem:[#allocation2 + $0x30] sm:$0xff] %vm25_vm1, %v561_v1  ;;  %33 = vst.msk [vmem:[#allocation2 + $0x38] sm:$0xff] %vm25_vm1, %v561_v1  ;;  %499 = vmatprep.mubr.msk.bf16.mxu0 %vm121_vm2, %v521_v2  ;;  %507 = vmatprep.mubr.msk.bf16.mxu1 %vm121_vm2, %v522_v4  ;;  %v526_v8 = vld [vmem:[%s806_s0 + $0x30] sm:$0xff]   ;;  %v527_v9 = vld [vmem:[%s806_s0 + $0x18] sm:$0xff]  }
   0x5   :  { %34 = vst.msk [vmem:[#allocation2 + $0x40] sm:$0xff] %vm25_vm1, %v561_v1  ;;  %35 = vst.msk [vmem:[#allocation2 + $0x48] sm:$0xff] %vm25_vm1, %v561_v1  ;;  %v528_v10 = vld [vmem:[%s806_s0 + $0x38] sm:$0xff]   ;;  %v655_v37 = vld [vmem:[%s807_s2] ss:$0 sm:$0xff] }
   0x6   :  { %36 = vst.msk [vmem:[#allocation2 + $0x50] sm:$0xff] %vm25_vm1, %v561_v1  ;;  %37 = vst.msk [vmem:[#allocation2 + $0x58] sm:$0xff] %vm25_vm1, %v561_v1  ;;  %500 = vmatmul.mubr.msk.bf16.vlgmr.msra.gmra.mxu0 %vm121_vm2, %v523_v5  ;;  %508 = vmatmul.mubr.msk.bf16.vlgmr.msra.gmra.mxu1 %vm121_vm2, %v524_v6 }
   0x7   :  { %38 = vst.msk [vmem:[#allocation2 + $0x60] sm:$0xff] %vm25_vm1, %v561_v1  ;;  %39 = vst.msk [vmem:[#allocation2 + $0x68] sm:$0xff] %vm25_vm1, %v561_v1  ;;  %503 = vmatprep.mubr.msk.bf16.mxu0 %vm121_vm2, %v525_v7  ;;  %511 = vmatprep.mubr.msk.bf16.mxu1 %vm121_vm2, %v526_v8 }
   0x8   :  { %40 = vst.msk [vmem:[#allocation2 + $0x70] sm:$0xff] %vm25_vm1, %v561_v1  ;;  %41 = vst.msk [vmem:[#allocation2 + $0x78] sm:$0xff] %vm25_vm1, %v561_v1  ;;  %v44_v11 = vld [vmem:[#allocation2 + $0x10] sm:$0xff]  ;;  %v42_v15 = vld [vmem:[#allocation2] sm:$0xff] }
   0x9   :  { %v45_v21 = vld [vmem:[#allocation2 + $0x18] sm:$0xff]  ;;  %v43_v27 = vld [vmem:[#allocation2 + $0x8] sm:$0xff] }
   0xa   :  { %v46_v40 = vld [vmem:[#allocation2 + $0x20] sm:$0xff]  ;;  %v47_v58 = vld [vmem:[#allocation2 + $0x28] sm:$0xff] }
   0xb   :  { %v48_v33 = vld [vmem:[#allocation2 + $0x30] sm:$0xff]  ;;  %v49_v52 = vld [vmem:[#allocation2 + $0x38] sm:$0xff] }
   0xc   :  { %v50_v16 = vld [vmem:[#allocation2 + $0x40] sm:$0xff]  ;;  %v51_v28 = vld [vmem:[#allocation2 + $0x48] sm:$0xff] }
   0xd   :  { %v52_v12 = vld [vmem:[#allocation2 + $0x50] sm:$0xff]  ;;  %v53_v22 = vld [vmem:[#allocation2 + $0x58] sm:$0xff] }
   0xe   :  { %504 = vmatmul.mubr.msk.bf16.gmra.mxu0 %vm121_vm2, %v527_v9  ;;  %512 = vmatmul.mubr.msk.bf16.gmra.mxu1 %vm121_vm2, %v528_v10  ;;  %v54_v41 = vld [vmem:[#allocation2 + $0x60] sm:$0xff]  ;;  %v55_v10 = vld [vmem:[#allocation2 + $0x68] sm:$0xff] }
   0xf   :  { %v56_v34 = vld [vmem:[#allocation2 + $0x70] sm:$0xff]  ;;  %v57_v53 = vld [vmem:[#allocation2 + $0x78] sm:$0xff] }
  0xc6   :  { %v501_v13 = vpop.f32.mrf.mxu0  ;;  %v509_v14 = vpop.f32.mrf.mxu1 }
  0xc7   :  { %v249_v17 = vadd.f32 %v501_v13, %v44_v11  ;;  %v257_v18 = vadd.f32 %v509_v14, %v52_v12 }
  0xc8   :  { %v184_v19 = vpop.f32.mrf.mxu0  ;;  %v216_v20 = vpop.f32.mrf.mxu1 }
  0xc9   :  { %266 = vst.msk [vmem:[#allocation2 + $0x10] sm:$0xff] %vm25_vm1, %v249_v17  ;;  %274 = vst.msk [vmem:[#allocation2 + $0x50] sm:$0xff] %vm25_vm1, %v257_v18  ;;  %v247_v23 = vadd.f32 %v184_v19, %v42_v15  ;;  %v255_v24 = vadd.f32 %v216_v20, %v50_v16 }
  0xca   :  { %v502_v25 = vpop.f32.mrf.mxu0  ;;  %v510_v26 = vpop.f32.mrf.mxu1 }
  0xcb   :  { %264 = vst.msk [vmem:[#allocation2] sm:$0xff] %vm25_vm1, %v247_v23  ;;  %272 = vst.msk [vmem:[#allocation2 + $0x40] sm:$0xff] %vm25_vm1, %v255_v24  ;;  %v250_v29 = vadd.f32 %v502_v25, %v45_v21  ;;  %v258_v30 = vadd.f32 %v510_v26, %v53_v22 }
  0xcc   :  { %v187_v31 = vpop.f32.mrf.mxu0  ;;  %v219_v32 = vpop.f32.mrf.mxu1 }
  0xcd   :  { %267 = vst.msk [vmem:[#allocation2 + $0x18] sm:$0xff] %vm25_vm1, %v250_v29  ;;  %275 = vst.msk [vmem:[#allocation2 + $0x58] sm:$0xff] %vm25_vm1, %v258_v30  ;;  %v248_v35 = vadd.f32 %v187_v31, %v43_v27  ;;  %v256_v36 = vadd.f32 %v219_v32, %v51_v28 }
  0xce   :  { %v505_v38 = vpop.f32.mrf.mxu0  ;;  %v513_v39 = vpop.f32.mrf.mxu1 }
  0xcf   :  { %265 = vst.msk [vmem:[#allocation2 + $0x8] sm:$0xff] %vm25_vm1, %v248_v35  ;;  %273 = vst.msk [vmem:[#allocation2 + $0x48] sm:$0xff] %vm25_vm1, %v256_v36  ;;  %v253_v42 = vadd.f32 %v505_v38, %v48_v33  ;;  %v261_v43 = vadd.f32 %v513_v39, %v56_v34 }
  0xd0   :  { %v285_v44 = vld [vmem:[#allocation2 + $0x10] sm:$0xff]  ;;  %v200_v46 = vpop.f32.mrf.mxu0  ;;  %v232_v47 = vpop.f32.mrf.mxu1 }
  0xd1   :  { %v293_v45 = vld [vmem:[#allocation2 + $0x50] sm:$0xff]  ;;  %v660_v48 = vadd.f32 %v655_v37, %v285_v44  ;;  %270 = vst.msk [vmem:[#allocation2 + $0x30] sm:$0xff] %vm25_vm1, %v253_v42  ;;  %278 = vst.msk [vmem:[#allocation2 + $0x70] sm:$0xff] %vm25_vm1, %v261_v43  ;;  %v251_v50 = vadd.f32 %v200_v46, %v46_v40  ;;  %v259_v51 = vadd.f32 %v232_v47, %v54_v41 }
  0xd2   :  { %v663_v49 = vadd.f32 %v655_v37, %v293_v45  ;;  %v283_v54 = vld [vmem:[#allocation2] sm:$0xff]  ;;  %v506_v56 = vpop.f32.mrf.mxu0  ;;  %v514_v57 = vpop.f32.mrf.mxu1 }
  0xd3   :  { %v291_v55 = vld [vmem:[#allocation2 + $0x40] sm:$0xff]  ;;  %v340_v59 = vmul.f32 0.70710677, %v660_v48  ;;  %268 = vst.msk [vmem:[#allocation2 + $0x20] sm:$0xff] %vm25_vm1, %v251_v50  ;;  %276 = vst.msk [vmem:[#allocation2 + $0x60] sm:$0xff] %vm25_vm1, %v259_v51  ;;  %v306_v61 = vadd.f32 %v655_v37, %v283_v54  ;;  %v254_v1 = vadd.f32 %v506_v56, %v49_v52  ;;  %v262_v2 = vadd.f32 %v514_v57, %v57_v53 }
  0xd4   :  { %v348_v60 = vmul.f32 0.70710677, %v663_v49  ;;  %v314_v62 = vadd.f32 %v655_v37, %v291_v55  ;;  %v286_v63 = vld [vmem:[#allocation2 + $0x18] sm:$0xff]  ;;  %v203_v3 = vpop.f32.mrf.mxu0  ;;  %v235_v11 = vpop.f32.mrf.mxu1  ;;  %v324_v40 = vmul.f32 0.5, %v660_v48  ;;  %v332_v41 = vmul.f32 0.5, %v663_v49 }
  0xd5   :  { %v294_v0 = vld [vmem:[#allocation2 + $0x58] sm:$0xff]  ;;  %529 = verf.f32 %v340_v59  ;;  %v309_v4 = vadd.f32 %v655_v37, %v286_v63  ;;  %v252_v6 = vadd.f32 %v203_v3, %v47_v58  ;;  %v338_v7 = vmul.f32 0.70710677, %v306_v61  ;;  %271 = vst.msk [vmem:[#allocation2 + $0x38] sm:$0xff] %vm25_vm1, %v254_v1  ;;  %279 = vst.msk [vmem:[#allocation2 + $0x78] sm:$0xff] %vm25_vm1, %v262_v2 }
  0xd6   :  { %v675_v5 = vadd.f32 %v655_v37, %v294_v0  ;;  %531 = verf.f32 %v348_v60  ;;  %v284_v8 = vld [vmem:[#allocation2 + $0x8] sm:$0xff]  ;;  %v346_v12 = vmul.f32 0.70710677, %v314_v62  ;;  %v260_v21 = vadd.f32 %v235_v11, %v55_v10  ;;  %v699_v48 = vld [vmem:[%s808_s3] ss:$0 sm:$0xff] }
  0xd7   :  { %v292_v9 = vld [vmem:[#allocation2 + $0x48] sm:$0xff]  ;;  %v341_v13 = vmul.f32 0.70710677, %v309_v4  ;;  %269 = vst.msk [vmem:[#allocation2 + $0x28] sm:$0xff] %vm25_vm1, %v252_v6  ;;  %533 = verf.f32 %v338_v7  ;;  %v307_v15 = vadd.f32 %v655_v37, %v284_v8  ;;  %v322_v44 = vmul.f32 0.5, %v306_v61 }
  0xd8   :  { %v349_v14 = vmul.f32 0.70710677, %v675_v5  ;;  %v315_v16 = vadd.f32 %v655_v37, %v292_v9  ;;  %v289_v17 = vld [vmem:[#allocation2 + $0x30] sm:$0xff]  ;;  %535 = verf.f32 %v346_v12  ;;  %277 = vst.msk [vmem:[#allocation2 + $0x68] sm:$0xff] %vm25_vm1, %v260_v21  ;;  %v330_v45 = vmul.f32 0.5, %v314_v62 }
  0xd9   :  { %v297_v18 = vld [vmem:[#allocation2 + $0x70] sm:$0xff]  ;;  %v312_v19 = vadd.f32 %v655_v37, %v289_v17  ;;  %537 = verf.f32 %v341_v13  ;;  %v339_v22 = vmul.f32 0.70710677, %v307_v15  ;;  %v325_v52 = vmul.f32 0.5, %v309_v4 }
  0xda   :  { %v320_v20 = vadd.f32 %v655_v37, %v297_v18  ;;  %v287_v23 = vld [vmem:[#allocation2 + $0x20] sm:$0xff]  ;;  %539 = verf.f32 %v349_v14  ;;  %v347_v25 = vmul.f32 0.70710677, %v315_v16  ;;  %v333_v54 = vmul.f32 0.5, %v675_v5 }
  0xdb   :  { %v295_v24 = vld [vmem:[#allocation2 + $0x60] sm:$0xff]  ;;  %v344_v26 = vmul.f32 0.70710677, %v312_v19  ;;  %541 = verf.f32 %v339_v22  ;;  %v310_v28 = vadd.f32 %v655_v37, %v287_v23  ;;  %v323_v55 = vmul.f32 0.5, %v307_v15 }
  0xdc   :  { %v352_v27 = vmul.f32 0.70710677, %v320_v20  ;;  %543 = verf.f32 %v347_v25  ;;  %v318_v29 = vadd.f32 %v655_v37, %v295_v24  ;;  %v290_v30 = vld [vmem:[#allocation2 + $0x38] sm:$0xff]  ;;  %v331_v58 = vmul.f32 0.5, %v315_v16 }
  0xdd   :  { %v298_v31 = vld [vmem:[#allocation2 + $0x78] sm:$0xff]  ;;  %545 = verf.f32 %v344_v26  ;;  %v342_v32 = vmul.f32 0.70710677, %v310_v28  ;;  %v313_v33 = vadd.f32 %v655_v37, %v290_v30  ;;  %v328_v59 = vmul.f32 0.5, %v312_v19 }
  0xde   :  { %v288_v34 = vld [vmem:[#allocation2 + $0x28] sm:$0xff]  ;;  %547 = verf.f32 %v352_v27  ;;  %v350_v35 = vmul.f32 0.70710677, %v318_v29  ;;  %v321_v36 = vadd.f32 %v655_v37, %v298_v31  ;;  %v336_v0 = vmul.f32 0.5, %v320_v20 }
  0xdf   :  { %549 = verf.f32 %v342_v32  ;;  %v345_v38 = vmul.f32 0.70710677, %v313_v33  ;;  %v311_v39 = vadd.f32 %v655_v37, %v288_v34  ;;  %v296_v47 = vld [vmem:[#allocation2 + $0x68] sm:$0xff]  ;;  %v326_v1 = vmul.f32 0.5, %v310_v28 }
  0xe0   :  { %551 = verf.f32 %v350_v35  ;;  %v353_v42 = vmul.f32 0.70710677, %v321_v36  ;;  %v694_v53 = vadd.f32 %v655_v37, %v296_v47  ;;  %v706_v37 = vld [vmem:[%s809_s4] ss:$0 sm:$0xff]  ;;  %v334_v5 = vmul.f32 0.5, %v318_v29 }
  0xe1   :  { %553 = verf.f32 %v345_v38  ;;  %v343_v46 = vmul.f32 0.70710677, %v311_v39  ;;  %v329_v10 = vmul.f32 0.5, %v313_v33  ;;  %v337_v15 = vmul.f32 0.5, %v321_v36 }
  0xe2   :  { %v530_v43 = vpop.eup %529  ;;  %555 = verf.f32 %v353_v42  ;;  %v351_v60 = vmul.f32 0.70710677, %v694_v53  ;;  %v327_v25 = vmul.f32 0.5, %v311_v39 }
  0xe3   :  { %v532_v50 = vpop.eup %531  ;;  %v372_v51 = vadd.f32 1.0, %v530_v43  ;;  %557 = verf.f32 %v343_v46 }
  0xe4   :  { %v380_v49 = vadd.f32 1.0, %v532_v50  ;;  %v534_v56 = vpop.eup %533  ;;  %559 = verf.f32 %v351_v60 }
  0xe5   :  { %v388_v57 = vmul.f32 %v372_v51, %v324_v40  ;;  %v536_v61 = vpop.eup %535  ;;  %v370_v63 = vadd.f32 1.0, %v534_v56 }
  0xe6   :  { %v396_v62 = vmul.f32 %v380_v49, %v332_v41  ;;  %v538_v2 = vpop.eup %537  ;;  %v378_v4 = vadd.f32 1.0, %v536_v61 }
  0xe7   :  { %v411_v3 = vmul.f32 %v699_v48, %v388_v57  ;;  %v540_v6 = vpop.eup %539  ;;  %v386_v8 = vmul.f32 %v370_v63, %v322_v44  ;;  %v373_v9 = vadd.f32 1.0, %v538_v2 }
  0xe8   :  { %v419_v7 = vmul.f32 %v699_v48, %v396_v62  ;;  %v542_v11 = vpop.eup %541  ;;  %v394_v13 = vmul.f32 %v378_v4, %v330_v45  ;;  %v381_v14 = vadd.f32 1.0, %v540_v6 }
  0xe9   :  { %v434_v12 = vadd.f32 %v706_v37, %v411_v3  ;;  %v544_v16 = vpop.eup %543  ;;  %v409_v18 = vmul.f32 %v699_v48, %v386_v8  ;;  %v389_v19 = vmul.f32 %v373_v9, %v325_v52  ;;  %v371_v20 = vadd.f32 1.0, %v542_v11 }
  0xea   :  { %v442_v17 = vadd.f32 %v706_v37, %v419_v7  ;;  %v546_v21 = vpop.eup %545  ;;  %v417_v22 = vmul.f32 %v699_v48, %v394_v13  ;;  %v397_v23 = vmul.f32 %v381_v14, %v333_v54  ;;  %v379_v24 = vadd.f32 1.0, %v544_v16 }
  0xeb   :  { %450 = vst.msk [vmem:[%s810_s5 + $0x10] sm:$0xff] %vm25_vm1, %v434_v12  ;;  %v548_v26 = vpop.eup %547  ;;  %v432_v27 = vadd.f32 %v706_v37, %v409_v18  ;;  %v412_v28 = vmul.f32 %v699_v48, %v389_v19  ;;  %v387_v29 = vmul.f32 %v371_v20, %v323_v55  ;;  %v376_v30 = vadd.f32 1.0, %v546_v21 }
  0xec   :  { %458 = vst.msk [vmem:[%s810_s5 + $0x50] sm:$0xff] %vm25_vm1, %v442_v17  ;;  %v550_v31 = vpop.eup %549  ;;  %v440_v32 = vadd.f32 %v706_v37, %v417_v22  ;;  %v420_v33 = vmul.f32 %v699_v48, %v397_v23  ;;  %v395_v34 = vmul.f32 %v379_v24, %v331_v58  ;;  %v384_v35 = vadd.f32 1.0, %v548_v26 }
  0xed   :  { %v552_v36 = vpop.eup %551  ;;  %448 = vst.msk [vmem:[%s810_s5] sm:$0xff] %vm25_vm1, %v432_v27  ;;  %v435_v38 = vadd.f32 %v706_v37, %v412_v28  ;;  %v410_v39 = vmul.f32 %v699_v48, %v387_v29  ;;  %v392_v40 = vmul.f32 %v376_v30, %v328_v59  ;;  %v374_v41 = vadd.f32 1.0, %v550_v31 }
  0xee   :  { %v554_v42 = vpop.eup %553  ;;  %456 = vst.msk [vmem:[%s810_s5 + $0x40] sm:$0xff] %vm25_vm1, %v440_v32  ;;  %v443_v43 = vadd.f32 %v706_v37, %v420_v33  ;;  %v418_v44 = vmul.f32 %v699_v48, %v395_v34  ;;  %v400_v45 = vmul.f32 %v384_v35, %v336_v0  ;;  %v382_v46 = vadd.f32 1.0, %v552_v36 }
  0xef   :  { %v556_v47 = vpop.eup %555  ;;  %451 = vst.msk [vmem:[%s810_s5 + $0x18] sm:$0xff] %vm25_vm1, %v435_v38  ;;  %v433_v50 = vadd.f32 %v706_v37, %v410_v39  ;;  %v415_v51 = vmul.f32 %v699_v48, %v392_v40  ;;  %v390_v52 = vmul.f32 %v374_v41, %v326_v1  ;;  %v377_v49 = vadd.f32 1.0, %v554_v42 }
  0xf0   :  { %v558_v54 = vpop.eup %557  ;;  %459 = vst.msk [vmem:[%s810_s5 + $0x58] sm:$0xff] %vm25_vm1, %v443_v43  ;;  %v441_v55 = vadd.f32 %v706_v37, %v418_v44  ;;  %v423_v56 = vmul.f32 %v699_v48, %v400_v45  ;;  %v398_v57 = vmul.f32 %v382_v46, %v334_v5  ;;  %v385_v58 = vadd.f32 1.0, %v556_v47 }
  0xf1   :  { %449 = vst.msk [vmem:[%s810_s5 + $0x8] sm:$0xff] %vm25_vm1, %v433_v50  ;;  %v438_v59 = vadd.f32 %v706_v37, %v415_v51  ;;  %v413_v60 = vmul.f32 %v699_v48, %v390_v52  ;;  %v393_v61 = vmul.f32 %v377_v49, %v329_v10  ;;  %v375_v62 = vadd.f32 1.0, %v558_v54  ;;  %v560_v2 = vpop.eup %559 }
  0xf2   :  { %457 = vst.msk [vmem:[%s810_s5 + $0x48] sm:$0xff] %vm25_vm1, %v441_v55  ;;  %v446_v63 = vadd.f32 %v706_v37, %v423_v56  ;;  %v421_v0 = vmul.f32 %v699_v48, %v398_v57  ;;  %v401_v1 = vmul.f32 %v385_v58, %v337_v15  ;;  %v335_v8 = vmul.f32 0.5, %v694_v53 }
  0xf3   :  { %454 = vst.msk [vmem:[%s810_s5 + $0x30] sm:$0xff] %vm25_vm1, %v438_v59  ;;  %v436_v3 = vadd.f32 %v706_v37, %v413_v60  ;;  %v416_v4 = vmul.f32 %v699_v48, %v393_v61  ;;  %v391_v5 = vmul.f32 %v375_v62, %v327_v25  ;;  %v383_v9 = vadd.f32 1.0, %v560_v2 }
  0xf4   :  { %462 = vst.msk [vmem:[%s810_s5 + $0x70] sm:$0xff] %vm25_vm1, %v446_v63  ;;  %v444_v6 = vadd.f32 %v706_v37, %v421_v0  ;;  %v424_v7 = vmul.f32 %v699_v48, %v401_v1 }
  0xf5   :  { %452 = vst.msk [vmem:[%s810_s5 + $0x20] sm:$0xff] %vm25_vm1, %v436_v3  ;;  %v439_v10 = vadd.f32 %v706_v37, %v416_v4  ;;  %v414_v11 = vmul.f32 %v699_v48, %v391_v5  ;;  %v399_v13 = vmul.f32 %v383_v9, %v335_v8 }
  0xf6   :  { %460 = vst.msk [vmem:[%s810_s5 + $0x60] sm:$0xff] %vm25_vm1, %v444_v6  ;;  %v447_v12 = vadd.f32 %v706_v37, %v424_v7 }
  0xf7   :  { %455 = vst.msk [vmem:[%s810_s5 + $0x38] sm:$0xff] %vm25_vm1, %v439_v10  ;;  %v437_v53 = vadd.f32 %v706_v37, %v414_v11  ;;  %v422_v14 = vmul.f32 %v699_v48, %v399_v13 }
  0xf8   :  { %463 = vst.msk [vmem:[%s810_s5 + $0x78] sm:$0xff] %vm25_vm1, %v447_v12 }
  0xf9   :  { %453 = vst.msk [vmem:[%s810_s5 + $0x28] sm:$0xff] %vm25_vm1, %v437_v53  ;;  %v445_v15 = vadd.f32 %v706_v37, %v422_v14 }
  0xfb   :  { %461 = vst.msk [vmem:[%s810_s5 + $0x68] sm:$0xff] %vm25_vm1, %v445_v15 }

</bundles_post_ra>
